<compile_context>
chip_gen: v7x
topology: tpu7x:2x2x1
jax: 0.10.0
libtpu: 0.0.40
codegen_flags: <defaults>
</compile_context>

<pallas_src>
import functools

import jax
import jax.numpy as jnp
from jax import lax
from jax.experimental import pallas as pl
from jax.experimental.pallas import tpu as pltpu

_EPS = 1e-5
_LOG_CLAMP = -100.0  # torch.nn.BCELoss clamps log() at -100


def _bce_jaccard_kernel(o_ref, t_ref, bce_sum_ref, jac_sum_ref, *, n_rows, eps):
    i = pl.program_id(0)

    @pl.when(i == 0)
    def _init():
        bce_sum_ref[...] = jnp.zeros_like(bce_sum_ref)
        jac_sum_ref[...] = jnp.zeros_like(jac_sum_ref)

    o = o_ref[...].astype(jnp.float32)     # (TM, C), f32 compute regardless of input dtype
    t = t_ref[...].astype(jnp.float32)     # (TM, C)
    tm, c = o.shape

    # Mask rows of the (possibly partial) last tile so garbage never leaks in.
    row_ids = i * tm + lax.broadcasted_iota(jnp.int32, (tm, c), 0)
    valid = row_ids < n_rows

    # --- BCE per element (log clamped at -100 like torch.nn.BCELoss) ---
    log_o = jnp.maximum(jnp.log(o), _LOG_CLAMP)
    log_1mo = jnp.maximum(jnp.log(1.0 - o), _LOG_CLAMP)
    bce = -(t * log_o + (1.0 - t) * log_1mo)

    # --- Jaccard per element ---
    nom = t * o
    jac = nom / (t + o - nom + eps) + eps

    bce_sum_ref[...] += jnp.sum(jnp.where(valid, bce, 0.0))
    jac_sum_ref[...] += jnp.sum(jnp.where(valid, jac, 0.0))


def _round_up(x, m):
    return ((x + m - 1) // m) * m


def _as_2d(x):
    """Flatten to a lane-friendly 2-D view (no data copy, just a reshape)."""
    total = x.size
    if total % 128 == 0:
        return x.reshape(total // 128, 128)
    if x.ndim >= 2:
        c = x.shape[-1]
        return x.reshape(total // c, c)
    return x.reshape(1, total)


def _pick_tile_rows(n_rows, n_cols, itemsize):
    # Target ~2 MiB per input buffer: with 2 inputs x 2 pipeline buffers that is
    # ~8 MiB, safely inside the default scoped VMEM limit on v5e (16 MiB) and
    # the 32 MiB scoped budget on v6e / v7x, while still a big streaming tile.
    lane_pad = _round_up(max(n_cols, 1), 128)
    budget = 2 * 1024 * 1024
    tm = max(8, (budget // (lane_pad * itemsize)) // 8 * 8)
    return min(tm, _round_up(n_rows, 8))


def bce_jaccard_sim(outputs, targets, reduction="mean"):
    """Forward pass of BCEJaccardSim (reduction='mean')."""
    if reduction != "mean":
        raise NotImplementedError(
            "BCEJaccardSim has no reduction {}, use 'mean' instead".format(reduction))
    if outputs.shape != targets.shape:
        raise ValueError("outputs shape {} must equal targets shape {}".format(
            outputs.shape, targets.shape))

    o2 = _as_2d(outputs)            # native dtype; cast happens inside the kernel
    t2 = _as_2d(targets)
    n_rows, n_cols = o2.shape
    tm = _pick_tile_rows(n_rows, n_cols, o2.dtype.itemsize)
    grid = (pl.cdiv(n_rows, tm),)

    kernel = functools.partial(_bce_jaccard_kernel, n_rows=n_rows, eps=_EPS)
    bce_sum, jac_sum = pl.pallas_call(
        kernel,
        out_shape=(jax.ShapeDtypeStruct((1, 1), jnp.float32),
                   jax.ShapeDtypeStruct((1, 1), jnp.float32)),
        grid=grid,
        in_specs=[pl.BlockSpec((tm, n_cols), lambda i: (i, 0)),
                  pl.BlockSpec((tm, n_cols), lambda i: (i, 0))],
        out_specs=[pl.BlockSpec((1, 1), lambda i: (0, 0)),
                   pl.BlockSpec((1, 1), lambda i: (0, 0))],
        compiler_params=pltpu.CompilerParams(
            dimension_semantics=("arbitrary",)),
    )(o2, t2)

    # Scalar finalize in plain JAX (O(1) work).
    total = jnp.float32(outputs.size)
    bce_mean = bce_sum[0, 0] / total
    jac_mean = jac_sum[0, 0] / total
    return bce_mean - jnp.log(jac_mean)


if __name__ == "__main__":
    key = jax.random.PRNGKey(0)
    k_o, k_t = jax.random.split(key)

    # Small segmentation-style shapes: probabilities + binary masks.
    B, C, H, W = 2, 4, 16, 16
    outputs = jax.nn.sigmoid(jax.random.normal(k_o, (B, C, H, W), dtype=jnp.float32))
    targets = (jax.random.uniform(k_t, (B, C, H, W)) > 0.5).astype(jnp.float32)

    loss = bce_jaccard_sim(outputs, targets)
    jax.block_until_ready(loss)

    # Plain-JAX reference (no clamping needed: sigmoid outputs are strictly in (0,1)).
    o = outputs.astype(jnp.float32)
    t = targets.astype(jnp.float32)
    bce_ref = jnp.mean(-(t * jnp.log(o) + (1.0 - t) * jnp.log(1.0 - o)))
    nom = t * o
    jac_ref = -jnp.log(jnp.mean(nom / (t + o - nom + 1e-5) + 1e-5))
    ref = bce_ref + jac_ref
    assert jnp.allclose(loss, ref, rtol=1e-5, atol=1e-5), (loss, ref)

    print("KERNEL_OK")
</pallas_src>

<mosaic_0001>
module attributes {stable_mosaic.version = 11 : i64} {
  func.func @_bce_jaccard_kernel(%arg0: i32, %arg1: memref<16x128xf32, #tpu.memory_space<vmem>>, %arg2: memref<16x128xf32, #tpu.memory_space<vmem>>, %arg3: memref<1x1xf32, #tpu.memory_space<vmem>>, %arg4: memref<1x1xf32, #tpu.memory_space<vmem>>) attributes {dimension_semantics = [#tpu.dimension_semantics<arbitrary>], iteration_bounds = array<i64: 1>, scalar_prefetch = 0 : i64, scratch_operands = 0 : i64, tpu.core_type = #tpu.core_type<tc>, window_params = [{transform_indices = @transform_0, window_bounds = array<i64: 16, 128>}, {transform_indices = @transform_1, window_bounds = array<i64: 16, 128>}, {pipeline_mode = #tpu.pipeline_mode<synchronous>, transform_indices = @transform_2, window_bounds = array<i64: 1, 1>}, {pipeline_mode = #tpu.pipeline_mode<synchronous>, transform_indices = @transform_3, window_bounds = array<i64: 1, 1>}]} {
    %c0_i32 = arith.constant 0 : i32
    %0 = arith.cmpi eq, %arg0, %c0_i32 : i32
    %1 = arith.extui %0 : i1 to i32
    %c0_i32_0 = arith.constant 0 : i32
    %2 = arith.cmpi ne, %1, %c0_i32_0 : i32
    scf.if %2 {
      %cst_23 = arith.constant 0.000000e+00 : f32
      %54 = vector.broadcast %cst_23 : f32 to vector<1x1xf32>
      %c0_24 = arith.constant 0 : index
      %c0_25 = arith.constant 0 : index
      %55 = vector.load %arg3[%c0_24, %c0_25] : memref<1x1xf32, #tpu.memory_space<vmem>>, vector<1x1xf32>
      tpu.vector_store %arg3[%c0_24, %c0_25], %54 {strides = array<i32>} : memref<1x1xf32, #tpu.memory_space<vmem>>, vector<1x1xf32>,
      %cst_26 = arith.constant 0.000000e+00 : f32
      %56 = vector.broadcast %cst_26 : f32 to vector<1x1xf32>
      %c0_27 = arith.constant 0 : index
      %c0_28 = arith.constant 0 : index
      %57 = vector.load %arg4[%c0_27, %c0_28] : memref<1x1xf32, #tpu.memory_space<vmem>>, vector<1x1xf32>
      tpu.vector_store %arg4[%c0_27, %c0_28], %56 {strides = array<i32>} : memref<1x1xf32, #tpu.memory_space<vmem>>, vector<1x1xf32>,
    } else {
    }
    %c0 = arith.constant 0 : index
    %c0_1 = arith.constant 0 : index
    %3 = vector.load %arg1[%c0, %c0_1] : memref<16x128xf32, #tpu.memory_space<vmem>>, vector<16x128xf32>
    %c0_2 = arith.constant 0 : index
    %c0_3 = arith.constant 0 : index
    %4 = vector.load %arg2[%c0_2, %c0_3] : memref<16x128xf32, #tpu.memory_space<vmem>>, vector<16x128xf32>
    %c16_i32 = arith.constant 16 : i32
    %5 = arith.muli %arg0, %c16_i32 : i32
    %6 = tpu.iota {dimensions = array<i32: 0>} : vector<16x128xi32>
    %7 = vector.broadcast %5 : i32 to vector<16x128xi32>
    %8 = arith.addi %7, %6 : vector<16x128xi32>
    %c16_i32_4 = arith.constant 16 : i32
    %9 = vector.broadcast %c16_i32_4 : i32 to vector<16x128xi32>
    %10 = arith.cmpi slt, %8, %9 : vector<16x128xi32>
    %11 = math.log %3 : vector<16x128xf32>
    %cst = arith.constant -1.000000e+02 : f32
    %12 = vector.broadcast %cst : f32 to vector<16x128xf32>
    %13 = arith.maximumf %11, %12 : vector<16x128xf32>
    %cst_5 = arith.constant 1.000000e+00 : f32
    %14 = vector.broadcast %cst_5 : f32 to vector<16x128xf32>
    %15 = arith.subf %14, %3 : vector<16x128xf32>
    %16 = math.log %15 : vector<16x128xf32>
    %cst_6 = arith.constant -1.000000e+02 : f32
    %17 = vector.broadcast %cst_6 : f32 to vector<16x128xf32>
    %18 = arith.maximumf %16, %17 : vector<16x128xf32>
    %19 = arith.mulf %4, %13 : vector<16x128xf32>
    %cst_7 = arith.constant 1.000000e+00 : f32
    %20 = vector.broadcast %cst_7 : f32 to vector<16x128xf32>
    %21 = arith.subf %20, %4 : vector<16x128xf32>
    %22 = arith.mulf %21, %18 : vector<16x128xf32>
    %23 = arith.addf %19, %22 : vector<16x128xf32>
    %cst_8 = arith.constant 0.000000e+00 : f32
    %24 = vector.broadcast %cst_8 : f32 to vector<16x128xf32>
    %25 = arith.subf %24, %23 : vector<16x128xf32>
    %26 = arith.mulf %4, %3 : vector<16x128xf32>
    %27 = arith.addf %4, %3 : vector<16x128xf32>
    %28 = arith.subf %27, %26 : vector<16x128xf32>
    %cst_9 = arith.constant 9.99999974E-6 : f32
    %29 = vector.broadcast %cst_9 : f32 to vector<16x128xf32>
    %30 = arith.addf %28, %29 : vector<16x128xf32>
    %31 = arith.divf %26, %30 : vector<16x128xf32>
    %cst_10 = arith.constant 9.99999974E-6 : f32
    %32 = vector.broadcast %cst_10 : f32 to vector<16x128xf32>
    %33 = arith.addf %31, %32 : vector<16x128xf32>
    %c0_11 = arith.constant 0 : index
    %c0_12 = arith.constant 0 : index
    %34 = vector.load %arg3[%c0_11, %c0_12] : memref<1x1xf32, #tpu.memory_space<vmem>>, vector<1x1xf32>
    %cst_13 = arith.constant 0.000000e+00 : f32
    %35 = vector.broadcast %cst_13 : f32 to vector<16x128xf32>
    %36 = arith.select %10, %25, %35 : vector<16x128xi1>, vector<16x128xf32>
    %37 = vector.shape_cast %36 : vector<16x128xf32> to vector<1x16x128xf32>
    %cst_14 = arith.constant dense<0.000000e+00> : vector<1xf32>
    %38 = vector.multi_reduction <add>, %37, %cst_14 [1, 2] : vector<1x16x128xf32> to vector<1xf32>
    %39 = vector.shape_cast %38 : vector<1xf32> to vector<1x1x1xf32>
    %40 = vector.extract %39[0, 0, 0] : f32 from vector<1x1x1xf32>
    %41 = vector.broadcast %40 : f32 to vector<1x1xf32>
    %42 = arith.addf %34, %41 : vector<1x1xf32>
    %c0_15 = arith.constant 0 : index
    %c0_16 = arith.constant 0 : index
    %43 = vector.load %arg3[%c0_15, %c0_16] : memref<1x1xf32, #tpu.memory_space<vmem>>, vector<1x1xf32>
    tpu.vector_store %arg3[%c0_15, %c0_16], %42 {strides = array<i32>} : memref<1x1xf32, #tpu.memory_space<vmem>>, vector<1x1xf32>,
    %c0_17 = arith.constant 0 : index
    %c0_18 = arith.constant 0 : index
    %44 = vector.load %arg4[%c0_17, %c0_18] : memref<1x1xf32, #tpu.memory_space<vmem>>, vector<1x1xf32>
    %cst_19 = arith.constant 0.000000e+00 : f32
    %45 = vector.broadcast %cst_19 : f32 to vector<16x128xf32>
    %46 = arith.select %10, %33, %45 : vector<16x128xi1>, vector<16x128xf32>
    %47 = vector.shape_cast %46 : vector<16x128xf32> to vector<1x16x128xf32>
    %cst_20 = arith.constant dense<0.000000e+00> : vector<1xf32>
    %48 = vector.multi_reduction <add>, %47, %cst_20 [1, 2] : vector<1x16x128xf32> to vector<1xf32>
    %49 = vector.shape_cast %48 : vector<1xf32> to vector<1x1x1xf32>
    %50 = vector.extract %49[0, 0, 0] : f32 from vector<1x1x1xf32>
    %51 = vector.broadcast %50 : f32 to vector<1x1xf32>
    %52 = arith.addf %44, %51 : vector<1x1xf32>
    %c0_21 = arith.constant 0 : index
    %c0_22 = arith.constant 0 : index
    %53 = vector.load %arg4[%c0_21, %c0_22] : memref<1x1xf32, #tpu.memory_space<vmem>>, vector<1x1xf32>
    tpu.vector_store %arg4[%c0_21, %c0_22], %52 {strides = array<i32>} : memref<1x1xf32, #tpu.memory_space<vmem>>, vector<1x1xf32>,
    return
  }
  func.func @transform_0(%arg0: i32) -> (i32, i32) {
    %c0_i32 = arith.constant 0 : i32
    %c0_i32_0 = arith.constant 0 : i32
    return %arg0, %c0_i32 : i32, i32
  }
  func.func @transform_1(%arg0: i32) -> (i32, i32) {
    %c0_i32 = arith.constant 0 : i32
    %c0_i32_0 = arith.constant 0 : i32
    return %arg0, %c0_i32 : i32, i32
  }
  func.func @transform_2(%arg0: i32) -> (i32, i32) {
    %c0_i32 = arith.constant 0 : i32
    %c0_i32_0 = arith.constant 0 : i32
    %c0_i32_1 = arith.constant 0 : i32
    return %c0_i32, %c0_i32_0 : i32, i32
  }
  func.func @transform_3(%arg0: i32) -> (i32, i32) {
    %c0_i32 = arith.constant 0 : i32
    %c0_i32_0 = arith.constant 0 : i32
    %c0_i32_1 = arith.constant 0 : i32
    return %c0_i32, %c0_i32_0 : i32, i32
  }
}

</mosaic_0001>

<bundles_post_ra>
// kernel: tpu_custom_call.1
= control target key start
LH: loop header
LB: loop body
LE: loop exit
PB: predicated region body
PF: predicated region fallthrough
CT: control target
= control target key end

     0   :  { %9 = vsyncpa [#allocation3], 0  ;;  %s362_s0 = inlined_call_operand.hbm [shape: f32[16,128], index: 0, kind: input, shape index: {}]   ;;  %s363_s1 = inlined_call_operand.hbm [shape: f32[16,128], index: 1, kind: input, shape index: {}]   ;;  %s364_s2 = inlined_call_operand.hbm [shape: f32[1,1], index: 2, kind: output, shape index: {0}]   ;;  %s365_s3 = inlined_call_operand.hbm [shape: f32[1,1], index: 3, kind: output, shape index: {1}]  }
   0x1   :  { %10 = vsyncpa [#allocation6], 0 }
   0x2   :  { %11 = vsyncpa [#allocation4], 0 }
   0x3   :  { %12 = vsyncpa [#allocation9], 0  ;;  %s283_s12 = smov [#allocation2]   ;;  %s187_s16 = scalar_lea.hbm %s362_s0, 256 }
   0x4   :  { %s18_s13 = sshll.u32 %s283_s12, 4  ;;  %p188_p0 = scmp.ne.s32.totalorder %s362_s0, %s187_s16  ;;  %s19_s13 = int_to_ptr.vmem [resolvable:$true] %s18_s13 }
   0x5   :  { %p191_p1 = scmp.lt.u32.totalorder %s187_s16, %s362_s0 }
   0x7   :  { %p193_p2 = pnand %p191_p1, %p188_p0 }
   0x9   :  { %196 = shalt.err (!%p193_p2)
}
   0xa   :  { %s197_s21 = scalar_lea.vmem %s19_s13, 256  ;;  %p202_p4 = scmp.lt.s32.totalorder %s19_s13, %s19_s13 }
   0xb   :  { %p198_p3 = scmp.ne.s32.totalorder %s19_s13, %s197_s21  ;;  %p203_p5 = scmp.lt.s32.totalorder %s197_s21, %s197_s21 }
   0xd   :  { %p204_p6 = por %p203_p5, %p202_p4 }
   0xf   :  { %p205_p7 = pnand %p204_p6, %p198_p3 }
  0x11   :  { %208 = shalt.err (!%p205_p7)
}
  0x12   :  { %s284_s22 = smov 128   ;;  %s285_s23 = smov 8  }
  0x13   :  { %24 = dma.hbm_to_vmem [thread:$0]  %s362_s0, 256, %s19_s13, [#allocation3], %s284_s22, %s284_s22, %s285_s23  }
  0x14   :  { %s286_s26 = smov [#allocation5]   ;;  %s209_s30 = scalar_lea.hbm %s363_s1, 256 }
  0x15   :  { %s30_s27 = sshll.u32 %s286_s26, 4  ;;  %p210_p8 = scmp.ne.s32.totalorder %s363_s1, %s209_s30  ;;  %s31_s27 = int_to_ptr.vmem [resolvable:$true] %s30_s27 }
  0x16   :  { %p213_p9 = scmp.lt.u32.totalorder %s209_s30, %s363_s1 }
  0x18   :  { %p215_p10 = pnand %p213_p9, %p210_p8 }
  0x1a   :  { %218 = shalt.err (!%p215_p10)
}
  0x1b   :  { %s219_s8 = scalar_lea.vmem %s31_s27, 256  ;;  %p224_p12 = scmp.lt.s32.totalorder %s31_s27, %s31_s27 }
  0x1c   :  { %p220_p11 = scmp.ne.s32.totalorder %s31_s27, %s219_s8  ;;  %p225_p13 = scmp.lt.s32.totalorder %s219_s8, %s219_s8 }
  0x1e   :  { %p226_p0 = por %p225_p13, %p224_p12 }
  0x20   :  { %p227_p1 = pnand %p226_p0, %p220_p11 }
  0x22   :  { %230 = shalt.err (!%p227_p1)
}
  0x23   :  { %36 = dma.hbm_to_vmem [thread:$0]  %s363_s1, 256, %s31_s27, [#allocation6], %s284_s22, %s284_s22, %s285_s23  }
  0x24   :  { %275 = dma.done.wait [#allocation3], 256  }
  0x25   :  { %276 = vsyncadd [#allocation3], 4294967040 }
  0x26   :  { %277 = dma.done.wait [#allocation6], 256  }
  0x27   :  { %278 = vsyncadd [#allocation6], 4294967040  ;;  %v50_v0 = vld [vmem:[#allocation2] sm:$0xff]  ;;  %v51_v1 = vld [vmem:[#allocation2 + $0x8] sm:$0xff]  ;;  %vm47_vm0 = vcmask 0   ;;  %v287_v44 = vmov 0.0  }
  0x28   :  { %v52_v2 = vld [vmem:[#allocation5] sm:$0xff]  ;;  %v53_v3 = vld [vmem:[#allocation5 + $0x8] sm:$0xff]  ;;  %175 = vlog2.f32 %v50_v0  ;;  %v69_v4 = vsub.f32 1.0, %v50_v0  ;;  %v70_v5 = vsub.f32 1.0, %v51_v1  ;;  %48 = vst.msk [vmem:[#allocation7] sm:$0x1] %vm47_vm0, %v287_v44 }
  0x29   :  { %177 = vlog2.f32 %v51_v1  ;;  %v87_v6 = vmul.f32 %v52_v2, %v50_v0  ;;  %v88_v7 = vmul.f32 %v53_v3, %v51_v1  ;;  %v89_v8 = vadd.f32 %v52_v2, %v50_v0  ;;  %49 = vst.msk [vmem:[#allocation8] sm:$0x1] %vm47_vm0, %v287_v44  ;;  %s288_s1 = smov [#allocation7]   ;;  %s289_s12 = smov [#allocation8]  }
  0x2a   :  { %179 = vlog2.f32 %v69_v4  ;;  %v90_v9 = vadd.f32 %v53_v3, %v51_v1  ;;  %v79_v22 = vsub.f32 1.0, %v52_v2  ;;  %v80_v25 = vsub.f32 1.0, %v53_v3  ;;  %s140_s10 = sshll.u32 %s288_s1, 4  ;;  %s150_s13 = sshll.u32 %s289_s12, 4  ;;  %s141_s10 = int_to_ptr.vmem [resolvable:$true] %s140_s10  ;;  %s151_s13 = int_to_ptr.vmem [resolvable:$true] %s150_s13 }
  0x2b   :  { %181 = vlog2.f32 %v70_v5  ;;  %v91_v10 = vsub.f32 %v89_v8, %v87_v6  ;;  %s231_s15 = scalar_lea.vmem %s141_s10, 16  ;;  %s235_s16 = scalar_lea.vmem %s141_s10, 32 }
  0x2c   :  { %v92_v11 = vsub.f32 %v90_v9, %v88_v7  ;;  %p232_p2 = scmp.ne.s32.totalorder %s141_s10, %s231_s15  ;;  %p236_p3 = scmp.lt.s32.totalorder %s141_s10, %s141_s10 }
  0x2d   :  { %v93_v12 = vadd.f32 1e-05, %v91_v10  ;;  %p237_p4 = scmp.lt.s32.totalorder %s235_s16, %s231_s15 }
  0x2e   :  { %v94_v13 = vadd.f32 1e-05, %v92_v11 }
  0x2f   :  { %183 = vrcp.f32 %v93_v12  ;;  %v101_v59 = vld [vmem:[#allocation7] sm:$0x1]  ;;  %p238_p5 = por %p237_p4, %p236_p3 }
  0x30   :  { %185 = vrcp.f32 %v94_v13  ;;  %v118_v62 = vld [vmem:[#allocation8] sm:$0x1] }
  0x31   :  { %p239_p6 = pnand %p238_p5, %p232_p2 }
  0x32   :  { %v176_v14 = vpop.eup %175 }
  0x33   :  { %v178_v15 = vpop.eup %177  ;;  %v64_v16 = vmul.f32 0.6931472, %v176_v14 }
  0x34   :  { %v180_v17 = vpop.eup %179  ;;  %v66_v18 = vmul.f32 0.6931472, %v178_v15 }
  0x35   :  { %v182_v19 = vpop.eup %181  ;;  %v67_v20 = vmax.f32 %v64_v16, -100.0  ;;  %v72_v21 = vmul.f32 0.6931472, %v180_v17 }
  0x36   :  { %v68_v23 = vmax.f32 %v66_v18, -100.0  ;;  %v74_v24 = vmul.f32 0.6931472, %v182_v19 }
  0x37   :  { %v75_v26 = vmax.f32 %v72_v21, -100.0  ;;  %v77_v27 = vmul.f32 %v67_v20, %v52_v2 }
  0x38   :  { %v76_v28 = vmax.f32 %v74_v24, -100.0  ;;  %v78_v29 = vmul.f32 %v68_v23, %v53_v3 }
  0x39   :  { %v81_v30 = vmul.f32 %v79_v22, %v75_v26  ;;  %v184_v31 = vpop.eup %183 }
  0x3a   :  { %v82_v32 = vmul.f32 %v80_v25, %v76_v28  ;;  %v186_v33 = vpop.eup %185  ;;  %v96_v35 = vmul.f32 %v184_v31, %v87_v6 }
  0x3b   :  { %v83_v34 = vadd.f32 %v81_v30, %v77_v27  ;;  %v98_v37 = vmul.f32 %v186_v33, %v88_v7 }
  0x3c   :  { %v84_v36 = vadd.f32 %v82_v32, %v78_v29  ;;  %v99_v40 = vadd.f32 1e-05, %v96_v35 }
  0x3d   :  { %v85_v38 = vsub.f32 0.0, %v83_v34  ;;  %v100_v41 = vadd.f32 1e-05, %v98_v37 }
  0x3e   :  { %v86_v39 = vsub.f32 0.0, %v84_v36 }
  0x3f   :  { %v121_v43 = vadd.f32 %v100_v41, %v99_v40 }
  0x40   :  { %v104_v42 = vadd.f32 %v86_v39, %v85_v38 }
  0x42   :  { %105 = vadd.xlane.f32.xlu0 %v104_v42 }
  0x46   :  { %122 = vadd.xlane.f32.xlu0 %v121_v43 }
  0xcf   :  { %v106_v45 = vpop.xlane.xlu0 %105 }
  0xd0   :  { %v107_v46 = vrot.slane %v106_v45, 4 }
  0xd2   :  { %v108_v47 = vadd.f32 %v107_v46, %v106_v45 }
  0xd3   :  { %v123_v48 = vpop.xlane.xlu0 %122 }
  0xd4   :  { %v109_v49 = vrot.slane %v108_v47, 2  ;;  %v124_v50 = vrot.slane %v123_v48, 4 }
  0xd6   :  { %v125_v51 = vadd.f32 %v124_v50, %v123_v48  ;;  %v110_v52 = vadd.f32 %v109_v49, %v108_v47 }
  0xd8   :  { %v126_v53 = vrot.slane %v125_v51, 2  ;;  %v111_v54 = vrot.slane %v110_v52, 1 }
  0xda   :  { %v127_v55 = vadd.f32 %v126_v53, %v125_v51  ;;  %v112_v56 = vadd.f32 %v111_v54, %v110_v52 }
  0xdc   :  { %164 = vpush %v112_v56  ;;  %v128_v57 = vrot.slane %v127_v55, 1 }
  0xde   :  { %v129_v58 = vadd.f32 %v128_v57, %v127_v55 }
  0xe0   :  { %166 = vpush %v129_v58 }
 0x10d   :  { %s165_s11 = spop %164 }
 0x10e   :  { %v114_v60 = vstv %s165_s11 }
 0x10f   :  { %v115_v61 = vadd.f32 %v114_v60, %v101_v59 }
 0x111   :  { %117 = vst.msk [vmem:[#allocation7] sm:$0x1] %vm47_vm0, %v115_v61  ;;  %s167_s14 = spop %166 }
 0x112   :  { %v131_v63 = vstv %s167_s14 }
 0x113   :  { %242 = shalt.err (!%p239_p6)
}
 0x114   :  { %s243_s19 = scalar_lea.hbm %s364_s2, 16 }
 0x115   :  { %p244_p7 = scmp.ne.s32.totalorder %s364_s2, %s243_s19  ;;  %p247_p8 = scmp.lt.u32.totalorder %s243_s19, %s364_s2 }
 0x117   :  { %p249_p9 = pnand %p247_p8, %p244_p7 }
 0x119   :  { %252 = shalt.err (!%p249_p9)
}
 0x11a   :  { %143 = dma.vmem_to_hbm [thread:$0]  %s141_s10, 16, %s364_s2, [#allocation4]   ;;  %v132_v0 = vadd.f32 %v131_v63, %v118_v62 }
 0x11b   :  { %s253_s26 = scalar_lea.vmem %s151_s13, 16  ;;  %s257_s27 = scalar_lea.vmem %s151_s13, 32 }
 0x11c   :  { %133 = vst.msk [vmem:[#allocation8] sm:$0x1] %vm47_vm0, %v132_v0  ;;  %p254_p10 = scmp.ne.s32.totalorder %s151_s13, %s253_s26  ;;  %p258_p11 = scmp.lt.s32.totalorder %s151_s13, %s151_s13 }
 0x11d   :  { %p259_p12 = scmp.lt.s32.totalorder %s257_s27, %s253_s26 }
 0x11f   :  { %p260_p13 = por %p259_p12, %p258_p11 }
 0x121   :  { %p261_p0 = pnand %p260_p13, %p254_p10 }
 0x123   :  { %264 = shalt.err (!%p261_p0)
}
 0x124   :  { %s265_s30 = scalar_lea.hbm %s365_s3, 16 }
 0x125   :  { %p266_p1 = scmp.ne.s32.totalorder %s365_s3, %s265_s30  ;;  %p269_p2 = scmp.lt.u32.totalorder %s265_s30, %s365_s3 }
 0x127   :  { %p271_p3 = pnand %p269_p2, %p266_p1 }
 0x129   :  { %274 = shalt.err (!%p271_p3)
}
 0x12a   :  { %153 = dma.vmem_to_hbm [thread:$0]  %s151_s13, 16, %s365_s3, [#allocation9]  }
 0x12b   :  { %279 = dma.done.wait [#allocation4], 16  }
 0x12c   :  { %280 = vsyncadd [#allocation4], 4294967280 }
 0x12d   :  { %281 = dma.done.wait [#allocation9], 16  }
 0x12e   :  { %282 = vsyncadd [#allocation9], 4294967280 }
 0x12f   :  { %160 = vsyncpa [#allocation3], 1 }
 0x130   :  { %161 = vsyncpa [#allocation6], 1 }
 0x131   :  { %162 = vsyncpa [#allocation4], 1 }
 0x132   :  { %163 = vsyncpa [#allocation9], 1 }

</bundles_post_ra>
